<compile_context>
chip_gen: v5e
topology: v5e:2x2
jax: 0.10.0
libtpu: 0.0.40
codegen_flags: <defaults>
</compile_context>

<pallas_src>
import collections
import functools

import jax
import jax.numpy as jnp
import numpy as np
from jax.experimental import pallas as pl
from jax.experimental.pallas import tpu as pltpu

EPS = 1e-8          # torch.nn.CosineSimilarity default eps
MAX_TILE_N = 512    # max batch rows per grid step (review: 512 ~ 85% roofline)

Formula = collections.namedtuple(
    "Formula", ["query_type", "target_mode", "anchor_modes", "rels"])
Query = collections.namedtuple("Query", ["anchor_nodes", "target_node"])


def _reverse_relation(relation):
  # graphqembed convention: (from_mode, rel_name, to_mode) -> reversed triple
  return (relation[-1], relation[1], relation[0])


def _round_up(x, m):
  return ((x + m - 1) // m) * m


# --------------------------------------------------------------------------
# Pallas kernels
# --------------------------------------------------------------------------
def _cosine(x, y):
  """Row-wise full cosine over the last axis (both inputs f32).

  torch: x.y / max(||x||*||y||, eps)  ==  x.y * rsqrt(max(||x||^2*||y||^2, eps^2))
  Returns a 1-D [tile_n] vector (lane-dense store downstream).
  """
  num = jnp.sum(x * y, axis=-1)
  n2 = jnp.sum(x * x, axis=-1) * jnp.sum(y * y, axis=-1)
  return num * jax.lax.rsqrt(jnp.maximum(n2, EPS * EPS))


def _chain_kernel(t_ref, a_ref, m_ref, o_ref):
  """1-chain: act = target @ (M_r0 @ M_r1 @ ...); score = cos(act, anchor).

  m_ref holds the pre-combined (f32-combined, bf16-cast) chain matrix.
  Raw (unnormalized) rows are fine: cosine is scale-invariant on both sides.
  """
  act = jnp.dot(t_ref[...], m_ref[...], preferred_element_type=jnp.float32)
  a = a_ref[...].astype(jnp.float32)
  o_ref[...] = _cosine(act, a)                         # [tile_n]


def _inter_kernel(three, d, t_ref, a12_ref, m_ref, o_ref):
  """2-inter / 3-inter.

  a12_ref = [a1 | a2] ([tile_n, 2D] bf16), m_ref = blockdiag(M1_T, M2_T)
  ([2D, 2D] bf16, resident), so one wide dot computes both branch projections
  and fills the 256-wide MXU.  p1/p2 are static 128-lane-aligned slices.
  """
  t = t_ref[...].astype(jnp.float32)                   # [tile_n, D]
  p = jnp.dot(a12_ref[...], m_ref[...],
              preferred_element_type=jnp.float32)      # [tile_n, 2D]
  p1 = p[:, :d]
  p2 = p[:, d:]
  nt2 = jnp.sum(t * t, axis=-1)                        # shared target norm^2
  num1 = jnp.sum(t * p1, axis=-1)
  num2 = jnp.sum(t * p2, axis=-1)
  n1 = jnp.sum(p1 * p1, axis=-1)
  n2 = jnp.sum(p2 * p2, axis=-1)
  s1 = num1 * jax.lax.rsqrt(jnp.maximum(nt2 * n1, EPS * EPS))
  s2 = num2 * jax.lax.rsqrt(jnp.maximum(nt2 * n2, EPS * EPS))
  if three:
    # Reference bug reproduced: scores3 = cos(target, embeds2) == s2.
    # Branch 3 (a3 @ M3) is dead work and never enters the kernel.
    o_ref[...] = s1 * s2 * s2
  else:
    o_ref[...] = s1 * s2


def _run_kernel(kernel, embeds, mats, n):
  """Grid over the batch axis; resident bf16 weights; lane-dense score output."""
  tile_n = min(MAX_TILE_N, _round_up(max(n, 1), 16))   # 16: bf16 sublane pack
  n_pad = _round_up(n, tile_n)
  if n_pad != n:
    embeds = [jnp.pad(e, ((0, n_pad - n), (0, 0))) for e in embeds]
  num_tiles = n_pad // tile_n

  emb_specs = [pl.BlockSpec((tile_n, e.shape[-1]), lambda i: (i, 0))
               for e in embeds]
  # Constant index_map -> weight blocks stay resident in VMEM across steps.
  # TODO(synk): pipeline_mode=pl.Buffered(1) on mat_specs would drop the
  # redundant second weight buffer when D grows large (irrelevant at D=128).
  mat_specs = [pl.BlockSpec(m.shape, lambda i: (0, 0)) for m in mats]

  out = pl.pallas_call(
      kernel,
      grid=(num_tiles,),
      in_specs=emb_specs + mat_specs,
      # Lane-dense output: one [tile_n]-wide row per grid step (unmasked vst)
      # instead of a masked [tile_n, 1] column writeback.
      out_specs=pl.BlockSpec((None, tile_n), lambda i: (i, 0)),
      out_shape=jax.ShapeDtypeStruct((num_tiles, tile_n), jnp.float32),
      compiler_params=pltpu.CompilerParams(
          dimension_semantics=("parallel",)),      # megacore-shardable (v7x)
  )(*embeds, *mats)
  return out.reshape(-1)[:n]


def pallas_chain_forward(target, anchor, chain_mat):
  return _run_kernel(_chain_kernel, [target, anchor], [chain_mat],
                     target.shape[0])


def pallas_inter_forward(target, a12, m_bd, three):
  kernel = functools.partial(_inter_kernel, three, target.shape[-1])
  return _run_kernel(kernel, [target, a12], [m_bd], target.shape[0])


# --------------------------------------------------------------------------
# Model wrapper (glue: embedding gather, host-side matrix combine / cast)
# --------------------------------------------------------------------------
class SoftAndEncoderDecoderPallas:
  """Pallas port of SoftAndEncoderDecoder.forward (enc = lookup + L2-normalize,
  path_dec = bilinear metapath decoder with one [D, D] matrix per relation)."""

  def __init__(self, embed_tables, rel_mats):
    self.embed_tables = embed_tables     # dict mode -> [num_nodes, D] f32
    self.rel_mats = rel_mats             # dict rel-triple -> [D, D] f32
    self._mat_cache = {}                 # combined/transposed bf16 matrices

  # --- reference-path encoder (torch semantics: lookup + L2-normalize) -----
  def encode(self, nodes, mode):
    e = self.embed_tables[mode][jnp.asarray(nodes, dtype=jnp.int32)]
    nrm = jnp.linalg.norm(e, axis=-1, keepdims=True)
    return e / jnp.maximum(nrm, EPS)

  # --- kernel-path gather: raw rows, bf16.  No host normalization: the
  # in-kernel cosine divides by both norms and is invariant to positive
  # scaling of either side, so encode()'s L2-normalize is redundant work
  # (only the eps behavior on exact-zero rows differs).
  # TODO(synk): the embedding row gather could move in-kernel via scalar
  # prefetch + pl.Element row blocks to drop one more HBM round trip.
  def _gather_bf16(self, nodes, mode):
    e = self.embed_tables[mode][jnp.asarray(nodes, dtype=jnp.int32)]
    return e.astype(jnp.bfloat16)

  # --- host-side matrix preparation (combined in f32, cached, cast bf16) ----
  def _chain_mat(self, rels):
    """act @ M0 @ M1 @ ...  ==  act @ (M0 @ M1 @ ...)  (row-major chain)."""
    key = ("chain", tuple(rels))
    if key not in self._mat_cache:
      m = self.rel_mats[rels[0]]
      for r in rels[1:]:
        m = m @ self.rel_mats[r]                       # combine in f32
      self._mat_cache[key] = m.astype(jnp.bfloat16)
    return self._mat_cache[key]

  def _project_mat_t(self, rels_in_apply_order):
    """torch project applies M_r1 then M_r2 ... (column layout):
       total = M_rk @ ... @ M_r1 ; row-major combined matrix = total.T."""
    total = self.rel_mats[rels_in_apply_order[0]]
    for r in rels_in_apply_order[1:]:
      total = self.rel_mats[r] @ total
    return total.T                                     # f32

  def _inter_mat_bd(self, order1, order2):
    """blockdiag(M1_T, M2_T) so [a1|a2] @ BD = [a1@M1_T | a2@M2_T] in one dot."""
    key = ("inter_bd", tuple(order1), tuple(order2))
    if key not in self._mat_cache:
      m1 = self._project_mat_t(order1)                 # f32 [D, D]
      m2 = self._project_mat_t(order2)                 # f32 [D, D]
      z = jnp.zeros_like(m1)
      top = jnp.concatenate([m1, z], axis=1)
      bot = jnp.concatenate([z, m2], axis=1)
      self._mat_cache[key] = jnp.concatenate([top, bot], axis=0).astype(
          jnp.bfloat16)                                # [2D, 2D]
    return self._mat_cache[key]

  # --- forward -------------------------------------------------------------
  def forward(self, formula, queries, source_nodes):
    if formula.query_type == "1-chain":
      t = self._gather_bf16(source_nodes, formula.target_mode)
      a = self._gather_bf16([q.anchor_nodes[0] for q in queries],
                            formula.anchor_modes[0])
      return pallas_chain_forward(t, a, self._chain_mat(formula.rels))

    elif formula.query_type in ("2-inter", "3-inter"):
      t = self._gather_bf16(source_nodes, formula.target_mode)
      a1 = self._gather_bf16([q.anchor_nodes[0] for q in queries],
                             formula.anchor_modes[0])
      a2 = self._gather_bf16([q.anchor_nodes[1] for q in queries],
                             formula.anchor_modes[1])
      a12 = jnp.concatenate([a1, a2], axis=-1)         # [N, 2D] bf16
      order1 = (_reverse_relation(formula.rels[0]),)
      if len(formula.rels[1]) == 2:
        order2 = tuple(_reverse_relation(r) for r in formula.rels[1][::-1])
      else:
        order2 = (_reverse_relation(formula.rels[1]),)
      m_bd = self._inter_mat_bd(order1, order2)
      # 3-inter: the reference projects embeds3 but never uses it for the
      # score (scores3 = cos(target, embeds2)); skip that dead work entirely.
      return pallas_inter_forward(t, a12, m_bd,
                                  three=(formula.query_type == "3-inter"))
    else:
      raise Exception("Query type not supported for this model.")

  # TODO(synk): margin_loss uses Python random.choice for negative sampling;
  # host-side control flow is out of scope for the kernel port.


# --------------------------------------------------------------------------
# Pure-JAX f32 reference mirroring the torch code ([D, N] layout) for checking
# --------------------------------------------------------------------------
def reference_forward(model, formula, queries, source_nodes):
  def enc(nodes, mode):
    return model.encode(nodes, mode).T                 # [D, N] like torch

  def project(e, rel):
    return model.rel_mats[rel] @ e

  def cos(x, y):
    return jnp.sum(x * y, axis=0) / jnp.maximum(
        jnp.linalg.norm(x, axis=0) * jnp.linalg.norm(y, axis=0), EPS)

  if formula.query_type == "1-chain":
    act = enc(source_nodes, formula.target_mode).T
    for r in formula.rels:
      act = act @ model.rel_mats[r]
    a = enc([q.anchor_nodes[0] for q in queries], formula.anchor_modes[0])
    return cos(act.T, a)

  target = enc(source_nodes, formula.target_mode)
  e1 = project(enc([q.anchor_nodes[0] for q in queries],
                   formula.anchor_modes[0]),
               _reverse_relation(formula.rels[0]))
  e2 = enc([q.anchor_nodes[1] for q in queries], formula.anchor_modes[1])
  if len(formula.rels[1]) == 2:
    for i_rel in formula.rels[1][::-1]:
      e2 = project(e2, _reverse_relation(i_rel))
  else:
    e2 = project(e2, _reverse_relation(formula.rels[1]))
  s1 = cos(target, e1)
  s2 = cos(target, e2)
  if formula.query_type == "3-inter":
    _e3 = project(enc([q.anchor_nodes[2] for q in queries],
                      formula.anchor_modes[2]),
                  _reverse_relation(formula.rels[2]))
    s3 = cos(target, e2)      # reference bug reproduced
    return s1 * s2 * s3
  return s1 * s2


# --------------------------------------------------------------------------
if __name__ == "__main__":
  D = 128            # embedding dim (lane-aligned)
  N_NODES = 40       # nodes per mode
  N_QUERIES = 8      # batch of queries (padded to a multiple of 16 rows)

  key = jax.random.PRNGKey(0)
  keys = jax.random.split(key, 16)

  modes = ["m0", "m1", "m2"]
  embed_tables = {
      m: jax.random.normal(keys[i], (N_NODES, D), jnp.float32)
      for i, m in enumerate(modes)
  }

  base_rels = [("m0", "r0", "m1"), ("m0", "r1", "m1"),
               ("m0", "r2", "m2"), ("m1", "r3", "m2")]
  rel_mats = {}
  k_idx = 3
  for r in base_rels:
    rel_mats[r] = jax.random.normal(keys[k_idx], (D, D), jnp.float32) / jnp.sqrt(D)
    k_idx += 1
    rel_mats[_reverse_relation(r)] = (
        jax.random.normal(keys[k_idx], (D, D), jnp.float32) / jnp.sqrt(D))
    k_idx += 1

  anchor_ids = np.asarray(
      jax.random.randint(keys[12], (N_QUERIES, 3), 0, N_NODES))
  source_ids = np.asarray(
      jax.random.randint(keys[13], (N_QUERIES,), 0, N_NODES))
  queries = [
      Query(anchor_nodes=tuple(int(x) for x in anchor_ids[i]),
            target_node=int(source_ids[i]))
      for i in range(N_QUERIES)
  ]
  source_nodes = [int(x) for x in source_ids]

  model = SoftAndEncoderDecoderPallas(embed_tables, rel_mats)

  formulas = [
      Formula("1-chain", "m0", ("m1",), (("m0", "r0", "m1"),)),
      Formula("1-chain", "m0", ("m2",),
              (("m0", "r1", "m1"), ("m1", "r3", "m2"))),     # 2-rel chain
      Formula("2-inter", "m0", ("m1", "m2"),
              (("m0", "r0", "m1"),
               (("m0", "r1", "m1"), ("m1", "r3", "m2")))),   # chained branch
      Formula("3-inter", "m0", ("m1", "m1", "m2"),
              (("m0", "r0", "m1"), ("m0", "r1", "m1"), ("m0", "r2", "m2"))),
  ]

  for formula in formulas:
    scores = model.forward(formula, queries, source_nodes)
    scores = jax.block_until_ready(scores)
    ref = np.asarray(reference_forward(model, formula, queries, source_nodes))
    assert scores.shape == (N_QUERIES,)
    # bf16 streamed inputs -> slightly looser tolerance than the f32 reference
    np.testing.assert_allclose(np.asarray(scores), ref, rtol=1e-2, atol=2e-3)

  print("KERNEL_OK")
</pallas_src>

<mosaic_0001>
module attributes {stable_mosaic.version = 11 : i64} {
  func.func @_chain_kernel(%arg0: i32, %arg1: memref<16x128xbf16, #tpu.memory_space<vmem>>, %arg2: memref<16x128xbf16, #tpu.memory_space<vmem>>, %arg3: memref<128x128xbf16, #tpu.memory_space<vmem>>, %arg4: memref<1x16xf32, #tpu.memory_space<vmem>>) attributes {dimension_semantics = [#tpu.dimension_semantics<parallel>], iteration_bounds = array<i64: 1>, scalar_prefetch = 0 : i64, scratch_operands = 0 : i64, tpu.core_type = #tpu.core_type<tc>, window_params = [{transform_indices = @transform_0, window_bounds = array<i64: 16, 128>}, {transform_indices = @transform_1, window_bounds = array<i64: 16, 128>}, {pipeline_mode = #tpu.pipeline_mode<synchronous>, transform_indices = @transform_2, window_bounds = array<i64: 128, 128>}, {transform_indices = @transform_3, window_bounds = array<i64: 1, 16>}]} {
    %c0 = arith.constant 0 : index
    %c0_0 = arith.constant 0 : index
    %0 = vector.load %arg1[%c0, %c0_0] : memref<16x128xbf16, #tpu.memory_space<vmem>>, vector<16x128xbf16>
    %c0_1 = arith.constant 0 : index
    %c0_2 = arith.constant 0 : index
    %1 = vector.load %arg3[%c0_1, %c0_2] : memref<128x128xbf16, #tpu.memory_space<vmem>>, vector<128x128xbf16>
    %cst = arith.constant dense<0.000000e+00> : vector<16x128xf32>
    %2 = tpu.matmul %0, %1, %cst {dimension_numbers = #tpu.dot_dimension_numbers<[1], [0], [0], [1], [0, 0, 1, 1], [], []>} : vector<16x128xbf16>, vector<128x128xbf16>, vector<16x128xf32> -> vector<16x128xf32>
    %c0_3 = arith.constant 0 : index
    %c0_4 = arith.constant 0 : index
    %3 = vector.load %arg2[%c0_3, %c0_4] : memref<16x128xbf16, #tpu.memory_space<vmem>>, vector<16x128xbf16>
    %4 = arith.extf %3 : vector<16x128xbf16> to vector<16x128xf32>
    %5 = arith.mulf %2, %4 : vector<16x128xf32>
    %cst_5 = arith.constant dense<0.000000e+00> : vector<16xf32>
    %6 = vector.multi_reduction <add>, %5, %cst_5 [1] : vector<16x128xf32> to vector<16xf32>
    %7 = arith.mulf %2, %2 : vector<16x128xf32>
    %cst_6 = arith.constant dense<0.000000e+00> : vector<16xf32>
    %8 = vector.multi_reduction <add>, %7, %cst_6 [1] : vector<16x128xf32> to vector<16xf32>
    %9 = arith.mulf %4, %4 : vector<16x128xf32>
    %cst_7 = arith.constant dense<0.000000e+00> : vector<16xf32>
    %10 = vector.multi_reduction <add>, %9, %cst_7 [1] : vector<16x128xf32> to vector<16xf32>
    %11 = arith.mulf %8, %10 : vector<16xf32>
    %cst_8 = arith.constant 1.000000e-16 : f32
    %12 = vector.broadcast %cst_8 : f32 to vector<16xf32>
    %13 = arith.maximumf %11, %12 : vector<16xf32>
    %14 = math.rsqrt %13 : vector<16xf32>
    %15 = arith.mulf %6, %14 : vector<16xf32>
    %c0_9 = arith.constant 0 : index
    %c0_10 = arith.constant 0 : index
    %16 = vector.load %arg4[%c0_9, %c0_10] : memref<1x16xf32, #tpu.memory_space<vmem>>, vector<1x16xf32>
    %17 = vector.shape_cast %16 : vector<1x16xf32> to vector<16xf32>
    %18 = vector.shape_cast %15 : vector<16xf32> to vector<1x16xf32>
    tpu.vector_store %arg4[%c0_9, %c0_10], %18 {strides = array<i32>} : memref<1x16xf32, #tpu.memory_space<vmem>>, vector<1x16xf32>,
    return
  }
  func.func @transform_0(%arg0: i32) -> (i32, i32) {
    %c0_i32 = arith.constant 0 : i32
    %c0_i32_0 = arith.constant 0 : i32
    return %arg0, %c0_i32 : i32, i32
  }
  func.func @transform_1(%arg0: i32) -> (i32, i32) {
    %c0_i32 = arith.constant 0 : i32
    %c0_i32_0 = arith.constant 0 : i32
    return %arg0, %c0_i32 : i32, i32
  }
  func.func @transform_2(%arg0: i32) -> (i32, i32) {
    %c0_i32 = arith.constant 0 : i32
    %c0_i32_0 = arith.constant 0 : i32
    %c0_i32_1 = arith.constant 0 : i32
    return %c0_i32, %c0_i32_0 : i32, i32
  }
  func.func @transform_3(%arg0: i32) -> (i32, i32) {
    %c0_i32 = arith.constant 0 : i32
    %c0_i32_0 = arith.constant 0 : i32
    return %arg0, %c0_i32 : i32, i32
  }
}

</mosaic_0001>

<bundles_post_ra>
// kernel: tpu_custom_call.1
= control target key start
LH: loop header
LB: loop body
LE: loop exit
PB: predicated region body
PF: predicated region fallthrough
CT: control target
= control target key end

     0   :  { %8 = vsyncpa [#allocation3], 0  ;;  %s425_s0 = inlined_call_operand.hbm [shape: bf16[16,128], index: 0, kind: input, shape index: {}]   ;;  %s426_s1 = inlined_call_operand.hbm [shape: bf16[16,128], index: 1, kind: input, shape index: {}]   ;;  %s427_s2 = inlined_call_operand.hbm [shape: bf16[128,128], index: 2, kind: input, shape index: {}]   ;;  %s428_s3 = inlined_call_operand.hbm [shape: f32[1,16], index: 3, kind: output, shape index: {}]  }
   0x1   :  { %9 = vsyncpa [#allocation6], 0 }
   0x2   :  { %10 = vsyncpa [#allocation4], 0  ;;  %s28_s14 = sshll.u32 %s426_s1, 4  ;;  %s387_s15 = smov [#allocation5]   ;;  %s29_s14 = int_to_ptr.hbm [resolvable:$true] %s28_s14 }
   0x3   :  { %s30_s16 = sshll.u32 %s387_s15, 4  ;;  %s15_s19 = sshll.u32 %s425_s0, 4  ;;  %s31_s16 = int_to_ptr.vmem [resolvable:$true] %s30_s16  ;;  %s16_s19 = int_to_ptr.hbm [resolvable:$true] %s15_s19 }
   0x4   :  { %s388_s20 = smov 64   ;;  %s389_s21 = smov 4  }
   0x5   :  { %36 = dma.hbm_to_vmem [thread:$0]  %s29_s14, 128, %s31_s16, [#allocation6], %s388_s20, %s388_s20, %s389_s21  }
   0x6   :  { %s390_s22 = smov [#allocation2]   ;;  %s41_s26 = sshll.u32 %s427_s2, 4  ;;  %s42_s26 = int_to_ptr.hbm [resolvable:$true] %s41_s26 }
   0x7   :  { %s17_s23 = sshll.u32 %s390_s22, 4  ;;  %s391_s1 = smov [#allocation7]   ;;  %s18_s23 = int_to_ptr.vmem [resolvable:$true] %s17_s23 }
   0x8   :  { %23 = dma.hbm_to_vmem [thread:$0]  %s16_s19, 128, %s18_s23, [#allocation3], %s388_s20, %s388_s20, %s389_s21  }
   0x9   :  { %s43_s27 = sshll.u32 %s391_s1, 4  ;;  %s44_s27 = int_to_ptr.vmem [resolvable:$true] %s43_s27 }
   0xa   :  { %49 = dma.hbm_to_vmem [thread:$0]  %s42_s26, 1024, %s44_s27, [#allocation6], %s388_s20, %s388_s20, %s389_s21  }
   0xb   :  { %381 = dma.done.wait [#allocation3], 128  }
   0xc   :  { %382 = vsyncadd [#allocation3], 4294967168 }
   0xd   :  { %383 = dma.done.wait [#allocation6], 1152  }
   0xe   :  { %384 = vsyncadd [#allocation6], 4294966144  ;;  %v270_v0 = vld [vmem:[#allocation7 + $0x38] sm:$0xff]  ;;  %v269_v1 = vld [vmem:[#allocation7 + $0x30] sm:$0xff]  ;;  %v198_v38 = vlaneseq  ;;  %s392_s0 = smov [#allocation8]   ;;  %s215_s30 = sshll.u32 %s428_s3, 4  ;;  %s216_s30 = int_to_ptr.hbm [resolvable:$true] %s215_s30 }
   0xf   :  { %134 = vmatpush.bf16.msra.mxu0 %v270_v0  ;;  %v268_v2 = vld [vmem:[#allocation7 + $0x28] sm:$0xff]  ;;  %v267_v3 = vld [vmem:[#allocation7 + $0x20] sm:$0xff]  ;;  %v266_v4 = vld [vmem:[#allocation7 + $0x18] sm:$0xff]  ;;  %s213_s2 = sshll.u32 %s392_s0, 4  ;;  %vm203_vm6 = vcmask 130112   ;;  %vm206_vm7 = vcmask 122880   ;;  %s214_s2 = int_to_ptr.vmem [resolvable:$true] %s213_s2 }
  0x10   :  { %v265_v5 = vld [vmem:[#allocation7 + $0x10] sm:$0xff]  ;;  %v264_v6 = vld [vmem:[#allocation7 + $0x8] sm:$0xff]  ;;  %v263_v7 = vld [vmem:[#allocation7] sm:$0xff]  ;;  %v199_v42 = vand.u32 127, %v198_v38 }
  0x11   :  { %v262_v8 = vld [vmem:[#allocation2] sm:$0xff]  ;;  %v272_v9 = vld [vmem:[#allocation5] sm:$0xff]  }
  0x12   :  { %v273_v10 = vunpack.c.l.bf16 %v272_v9  ;;  %v274_v12 = vunpack.c.h.bf16 %v272_v9  ;;  %v201_v45 = vadd.s32 4294967288, %v199_v42 }
  0x13   :  { %135 = vmatpush.bf16.msra.mxu0 %v269_v1 }
  0x14   :  { %v164_v11 = vmul.f32 %v273_v10, %v273_v10  ;;  %v165_v13 = vmul.f32 %v274_v12, %v274_v12 }
  0x16   :  { %166 = vadd.xlane.f32.xlu1 %v164_v11 }
  0x17   :  { %136 = vmatpush.bf16.msra.mxu0 %v268_v2 }
  0x1b   :  { %137 = vmatpush.bf16.msra.mxu0 %v267_v3 }
  0x1e   :  { %168 = vadd.xlane.f32.xlu1 %v165_v13 }
  0x1f   :  { %138 = vmatpush.bf16.msra.mxu0 %v266_v4 }
  0x23   :  { %139 = vmatpush.bf16.msra.mxu0 %v265_v5 }
  0x27   :  { %140 = vmatpush.bf16.msra.mxu0 %v264_v6 }
  0x2b   :  { %141 = vmatpush.bf16.msra.mxu0 %v263_v7 }
  0x2e   :  { %142 = vmatmul.bf16.vlgmr.msra.gmra.mxu0 %v262_v8 }
  0x89   :  { %v167_v20 = vpop.xlane.xlu1 %166 }
  0x91   :  { %v169_v24 = vpop.xlane.xlu1 %168 }
  0xab   :  { %v143_v14 = vpop.f32.mrf.mxu0 }
  0xac   :  { %v158_v15 = vmul.f32 %v143_v14, %v143_v14  ;;  %v152_v16 = vmul.f32 %v273_v10, %v143_v14 }
  0xae   :  { %160 = vadd.xlane.f32.xlu0 %v158_v15  ;;  %154 = vadd.xlane.f32.xlu2 %v152_v16 }
  0xb3   :  { %v145_v17 = vpop.f32.mrf.mxu0 }
  0xb4   :  { %v153_v18 = vmul.f32 %v274_v12, %v145_v17  ;;  %v159_v19 = vmul.f32 %v145_v17, %v145_v17 }
  0xb6   :  { %162 = vadd.xlane.f32.xlu0 %v159_v19  ;;  %156 = vadd.xlane.f32.xlu2 %v153_v18 }
 0x121   :  { %v161_v21 = vpop.xlane.xlu0 %160  ;;  %v155_v34 = vpop.xlane.xlu2 %154 }
 0x122   :  { %v170_v22 = vmul.f32 %v167_v20, %v161_v21 }
 0x124   :  { %v172_v23 = vmax.f32 %v170_v22, 1e-16 }
 0x126   :  { %281 = vrsqrt.f32 %v172_v23  ;;  %vm180_vm1 = vweird.f32 %v172_v23 }
 0x129   :  { %v163_v25 = vpop.xlane.xlu0 %162  ;;  %v157_v47 = vpop.xlane.xlu2 %156 }
 0x12a   :  { %v171_v26 = vmul.f32 %v169_v24, %v163_v25 }
 0x12c   :  { %v282_v27 = vpop.eup %281  ;;  %v173_v28 = vmax.f32 %v171_v26, 1e-16 }
 0x12d   :  { %v175_v29 = vmul.f32 %v282_v27, %v172_v23  ;;  %vm181_vm0 = vweird.f32 %v282_v27 }
 0x12e   :  { %283 = vrsqrt.f32 %v173_v28  ;;  %vm182_vm2 = vmor %vm180_vm1, %vm181_vm0  ;;  %vm190_vm4 = vweird.f32 %v173_v28 }
 0x12f   :  { %v176_v30 = vmul.f32 %v282_v27, %v175_v29 }
 0x131   :  { %v177_v31 = vmul.f32 0.5, %v176_v30 }
 0x133   :  { %v178_v32 = vsub.f32 1.5, %v177_v31 }
 0x134   :  { %v284_v33 = vpop.eup %283 }
 0x135   :  { %v185_v35 = vmul.f32 %v284_v33, %v173_v28  ;;  %v179_v36 = vmul.f32 %v282_v27, %v178_v32  ;;  %vm191_vm3 = vweird.f32 %v284_v33 }
 0x136   :  { %vm192_vm5 = vmor %vm190_vm4, %vm191_vm3 }
 0x137   :  { %v186_v37 = vmul.f32 %v284_v33, %v185_v35  ;;  %v183_v40 = vsel %vm182_vm2, %v282_v27, %v179_v36 }
 0x138   :  { %v194_v44 = vmul.f32 %v183_v40, %v155_v34 }
 0x139   :  { %v187_v39 = vmul.f32 0.5, %v186_v37 }
 0x13a   :  { %v200_v49 = vperm.slane %v194_v44, %v199_v42 }
 0x13b   :  { %v188_v41 = vsub.f32 1.5, %v187_v39 }
 0x13d   :  { %v189_v43 = vmul.f32 %v284_v33, %v188_v41 }
 0x13f   :  { %v193_v46 = vsel %vm192_vm5, %v284_v33, %v189_v43 }
 0x140   :  { %v195_v48 = vmul.f32 %v193_v46, %v157_v47 }
 0x142   :  { %v202_v50 = vperm.slane %v195_v48, %v201_v45 }
 0x144   :  { %v204_v51 = vsel %vm203_vm6, %v202_v50, %v200_v49 }
 0x145   :  { %207 = vst.msk [vmem:[#allocation8] sm:$0x1] %vm206_vm7, %v204_v51 }
 0x146   :  { %218 = dma.vmem_to_hbm [thread:$0]  %s214_s2, 16, %s216_s30, [#allocation4]  }
 0x147   :  { %385 = dma.done.wait [#allocation4], 16  }
 0x148   :  { %386 = vsyncadd [#allocation4], 4294967280 }
 0x149   :  { %223 = vsyncpa [#allocation3], 1 }
 0x14a   :  { %224 = vsyncpa [#allocation6], 1 }
 0x14b   :  { %225 = vsyncpa [#allocation4], 1 }

</bundles_post_ra>
